<compile_context>
chip_gen: v7x
topology: tpu7x:2x2x1
jax: 0.10.0
libtpu: 0.0.40
codegen_flags: <defaults>
</compile_context>

<pallas_src>
import jax
import jax.numpy as jnp
import numpy as np
from jax import lax
from jax.experimental import pallas as pl
from jax.experimental.pallas import tpu as pltpu

H = W = 16
HW = H * W                 # 256 = 2 * 128 lanes
C = 32                     # inplanes == planes (residual add requires this)
CR = C // 16               # reduced channels in the CA bottleneck (== 2)
N = 2
BN_EPS = 1e-5
OUT_LANES = 128


# ----------------------------------------------------------------------------
# Chip detection: batch folding on single-TC chips, bf16 slab build except on v5e.
# ----------------------------------------------------------------------------
def _tpu_config():
    try:
        kind = jax.devices()[0].device_kind.lower()
    except Exception:
        kind = ""
    is_v5e = ("v5e" in kind) or ("v5 lite" in kind) or ("v5lite" in kind)
    single_tc = is_v5e or ("v6e" in kind) or ("v6 lite" in kind) or ("v6lite" in kind)
    b_fold = N if single_tc else 1
    build_dtype = jnp.float32 if is_v5e else jnp.bfloat16
    return b_fold, build_dtype


# ----------------------------------------------------------------------------
# pltpu.roll direction probe (robust to either sign convention)
# ----------------------------------------------------------------------------
_ROLL_SIGN = None


def _detect_roll_semantics():
    """+1 if pltpu.roll matches jnp.roll (out[i] = in[(i - shift) % n]), else -1."""
    def probe(x_ref, o_ref):
        o_ref[...] = pltpu.roll(x_ref[...], shift=1, axis=1)

    x = jnp.tile(jnp.arange(128, dtype=jnp.int32)[None, :], (8, 1))
    out = pl.pallas_call(probe, out_shape=jax.ShapeDtypeStruct((8, 128), jnp.int32))(x)
    return 1 if int(out[0, 0]) == 127 else -1


def _roll_shift_for(k, n):
    """pltpu.roll shift amount so that result[:, r] == x[:, (r + k) % n]."""
    global _ROLL_SIGN
    if _ROLL_SIGN is None:
        _ROLL_SIGN = _detect_roll_semantics()
    return (-k) % n if _ROLL_SIGN == 1 else k % n


# ----------------------------------------------------------------------------
# Host-side precomputation (boundary masks + stacked SA shift matrix)
# ----------------------------------------------------------------------------
def _build_conv_masks_np():
    """(9, HW) f32: masks[t, r] == 1 iff tap t = (dy+1)*3 + (dx+1) stays inside the image."""
    m = np.zeros((9, HW), np.float32)
    for t in range(9):
        dy, dx = t // 3 - 1, t % 3 - 1
        for r in range(HW):
            h, w = divmod(r, W)
            if 0 <= h + dy < H and 0 <= w + dx < W:
                m[t, r] = 1.0
    return m


def _build_sa_matrix(w7):
    """(2*HW, HW) stacked shift+boundary matrix so the 7x7 SA conv is ONE MXU dot.

    sa_pre[r] = sum_{r'} avg_s[r'] * M[r', r] + max_s[r'] * M[HW + r', r]
    """
    w7 = np.asarray(w7)                       # (1, 2, 7, 7), values bf16-representable
    m = np.zeros((2 * HW, HW), np.float32)
    for r in range(HW):
        h, w = divmod(r, W)
        for dy in range(-3, 4):
            for dx in range(-3, 4):
                hh, ww = h + dy, w + dx
                if 0 <= hh < H and 0 <= ww < W:
                    src = hh * W + ww
                    m[src, r] = w7[0, 0, dy + 3, dx + 3]        # avg channel
                    m[HW + src, r] = w7[0, 1, dy + 3, dx + 3]   # max channel
    return jnp.asarray(m, jnp.bfloat16)


# ----------------------------------------------------------------------------
# Kernel (parameterized by roll shifts, batch-fold factor, slab-build dtype)
# ----------------------------------------------------------------------------
def _build_kernel(shifts, b_fold, build_dtype):
    L = b_fold * HW

    def varm_kernel(x_ref, w12_ref, pb_ref, mask_ref, sa_ref, out_ref, slab_ref):
        x = x_ref[...]                                       # (C, L) f32

        # packed small params: [b1, b2, wfc1 (C,CR), wfc2 (C,CR), pad, pad]
        pb = pb_ref[...]                                     # (C, 8) f32
        b1 = pb[:, 0:1]
        b2 = pb[:, 1:2]
        wfc1 = pb[:, 2:2 + CR]                               # (C, CR) fc1 weight (transposed)
        wfc2 = pb[:, 2 + CR:2 + 2 * CR]                      # (C, CR) fc2 weight

        def conv3x3(inp, w):
            # im2col: 9 shifted+masked copies stacked along sublanes, then one K=9C dot.
            src = inp.astype(build_dtype)
            for t in range(9):
                sh = src if shifts[t] == 0 else pltpu.roll(src, shift=shifts[t], axis=1)
                m = mask_ref[t:t + 1, :]                     # (1, L), same dtype as src
                slab_ref[t * C:(t + 1) * C, :] = (sh * m).astype(jnp.bfloat16)
            return jnp.dot(w, slab_ref[...], preferred_element_type=jnp.float32)

        # conv1 (bn1 scale folded into weights) -> +bias -> relu
        y = jnp.maximum(conv3x3(x, w12_ref[0:C, :]) + b1, 0.0)
        # conv2 (bn2 scale folded) -> +bias
        y = conv3x3(y, w12_ref[C:2 * C, :]) + b2

        sa_mat = sa_ref[...]                                 # (2*HW, HW) bf16

        for i in range(b_fold):                              # per-image tail (static loop)
            lo = i * HW
            yi = y[:, lo:lo + HW]                            # (C, HW) 128-aligned slice
            xi = x[:, lo:lo + HW]

            # ---- channel attention (VPU/XLU only: CR == 2 is far below MXU granularity)
            avg_c = jnp.mean(yi, axis=1, keepdims=True)      # (C, 1)
            max_c = jnp.max(yi, axis=1, keepdims=True)       # (C, 1)
            hid = (jnp.maximum(jnp.sum(wfc1 * avg_c, axis=0, keepdims=True), 0.0) +
                   jnp.maximum(jnp.sum(wfc1 * max_c, axis=0, keepdims=True), 0.0))  # (1, CR)
            ca = jax.nn.sigmoid(jnp.sum(wfc2 * hid, axis=1, keepdims=True))         # (C, 1)
            yi = yi * ca

            # ---- spatial attention: single fused K=2*HW dot against [m_avg; m_max]
            avg_s = jnp.mean(yi, axis=0, keepdims=True)      # (1, HW)
            max_s = jnp.max(yi, axis=0, keepdims=True)       # (1, HW)
            op = jnp.broadcast_to(jnp.concatenate([avg_s, max_s], axis=1),
                                  (8, 2 * HW)).astype(jnp.bfloat16)
            sa_pre = jnp.dot(op, sa_mat, preferred_element_type=jnp.float32)
            sa = jax.nn.sigmoid(sa_pre[0:1, :])              # (1, HW)
            yi = yi * sa

            # residual -> relu -> global average pool; lane-dense broadcast store.
            yi = jnp.maximum(yi + xi, 0.0)
            pooled = jnp.mean(yi, axis=1, keepdims=True)     # (C, 1)
            out_ref[:, i * OUT_LANES:(i + 1) * OUT_LANES] = jnp.broadcast_to(
                pooled, (C, OUT_LANES)).astype(out_ref.dtype)

    return varm_kernel


def varm_pallas(x_nchw, p, b_fold, build_dtype):
    n = x_nchw.shape[0]
    steps = n // b_fold
    L = b_fold * HW
    l_out = b_fold * OUT_LANES

    # NCHW -> channels on sublanes, H*W (x b_fold images) on lanes.
    x_flat = x_nchw.reshape(n, C, HW)
    if b_fold > 1:
        x_in = (x_flat.reshape(steps, b_fold, C, HW)
                .transpose(0, 2, 1, 3).reshape(steps, C, L))
    else:
        x_in = x_flat

    shifts = tuple(_roll_shift_for((t // 3 - 1) * W + (t % 3 - 1), L) for t in range(9))

    call = pl.pallas_call(
        _build_kernel(shifts, b_fold, build_dtype),
        out_shape=jax.ShapeDtypeStruct((steps, C, l_out), jnp.float32),
        grid_spec=pltpu.PrefetchScalarGridSpec(
            num_scalar_prefetch=0,
            grid=(steps,),
            in_specs=[
                pl.BlockSpec((None, C, L), lambda s: (s, 0, 0)),     # x (per grid step)
                pl.BlockSpec((2 * C, 9 * C), lambda s: (0, 0)),      # stacked conv weights (bf16)
                pl.BlockSpec((C, 8), lambda s: (0, 0)),              # packed biases + CA fc weights
                pl.BlockSpec((9, L), lambda s: (0, 0)),              # conv boundary masks
                pl.BlockSpec((2 * HW, HW), lambda s: (0, 0)),        # stacked SA matrix (bf16)
            ],
            out_specs=pl.BlockSpec((None, C, l_out), lambda s: (s, 0, 0)),
            scratch_shapes=[pltpu.VMEM((9 * C, L), jnp.bfloat16)],   # shared im2col slab
        ),
        compiler_params=pltpu.CompilerParams(dimension_semantics=("parallel",)),
    )
    out = call(x_in, p["w12_k"], p["pb_k"], p["masks_k"], p["sa_k"])
    out = out.reshape(steps, C, b_fold, OUT_LANES)[:, :, :, 0]       # (steps, C, b_fold)
    return jnp.transpose(out, (0, 2, 1)).reshape(n, C)


# ----------------------------------------------------------------------------
# Parameters + pure-JAX reference
# ----------------------------------------------------------------------------
def make_params(key, b_fold, build_dtype):
    ks = jax.random.split(key, 13)
    # Values that feed bf16 MXU dots are pre-rounded through bf16 so the f32 reference
    # uses exactly the same parameter values (only activation rounding differs).
    rnd = lambda a: a.astype(jnp.bfloat16).astype(jnp.float32)

    w1_raw = 0.05 * jax.random.normal(ks[0], (C, C, 3, 3), jnp.float32)
    w2_raw = 0.05 * jax.random.normal(ks[1], (C, C, 3, 3), jnp.float32)
    wfc1_pt = 0.1 * jax.random.normal(ks[2], (CR, C, 1, 1), jnp.float32)
    wfc2_pt = 0.1 * jax.random.normal(ks[3], (C, CR, 1, 1), jnp.float32)
    w7_pt = rnd(0.1 * jax.random.normal(ks[4], (1, 2, 7, 7), jnp.float32))

    def bn(kg, kb, km, kv):
        gamma = 1.0 + 0.1 * jax.random.normal(kg, (C,), jnp.float32)
        beta = 0.1 * jax.random.normal(kb, (C,), jnp.float32)
        mean = 0.1 * jax.random.normal(km, (C,), jnp.float32)
        var = jnp.abs(1.0 + 0.1 * jax.random.normal(kv, (C,), jnp.float32))
        scale = gamma / jnp.sqrt(var + BN_EPS)
        bias = beta - mean * scale
        return scale, bias

    s1, b1 = bn(ks[5], ks[6], ks[7], ks[8])
    s2, b2 = bn(ks[9], ks[10], ks[11], ks[12])

    # eval-mode BN: y = conv(x, W)*s + b == conv(x, s ⊙ W) + b.  Fold the scale into the
    # weights and bf16-round the folded weights identically for kernel and reference.
    w1_pt = rnd(w1_raw * s1[:, None, None, None])
    w2_pt = rnd(w2_raw * s2[:, None, None, None])

    def to_klayout(w):                       # (O,I,3,3) -> (O, kh*kw*I), tap-major
        return jnp.transpose(w, (0, 2, 3, 1)).reshape(C, 9 * C).astype(jnp.bfloat16)

    w12_k = jnp.concatenate([to_klayout(w1_pt), to_klayout(w2_pt)], axis=0)  # (2C, 9C) bf16

    pb_k = jnp.concatenate(
        [b1[:, None], b2[:, None],
         wfc1_pt[:, :, 0, 0].T,              # (C, CR)
         wfc2_pt[:, :, 0, 0],                # (C, CR)
         jnp.zeros((C, 8 - 2 - 2 * CR), jnp.float32)], axis=1)               # (C, 8) f32

    masks_np = np.tile(_build_conv_masks_np(), (1, b_fold))                  # (9, b_fold*HW)
    masks_k = jnp.asarray(masks_np, dtype=build_dtype)

    return dict(
        # PyTorch-layout values for the pure-JAX reference
        w1_pt=w1_pt, w2_pt=w2_pt, wfc1_pt=wfc1_pt, wfc2_pt=wfc2_pt, w7_pt=w7_pt,
        b1=b1, b2=b2,
        # kernel-layout values
        w12_k=w12_k, pb_k=pb_k, masks_k=masks_k, sa_k=_build_sa_matrix(w7_pt),
    )


def varm_ref(x_nchw, p):
    """Pure-JAX NCHW reference mirroring the PyTorch forward (eval-mode BN with the
    scale folded into the bf16-rounded conv weights), f32 everywhere."""
    def conv(x, w, pad):
        return lax.conv_general_dilated(
            x, w, window_strides=(1, 1), padding=[(pad, pad), (pad, pad)],
            dimension_numbers=("NCHW", "OIHW", "NCHW"))

    b1 = p["b1"].reshape(1, C, 1, 1)
    b2 = p["b2"].reshape(1, C, 1, 1)

    out = jnp.maximum(conv(x_nchw, p["w1_pt"], 1) + b1, 0.0)   # conv1 -> bn1 -> relu
    out = conv(out, p["w2_pt"], 1) + b2                        # conv2 -> bn2

    avg = out.mean(axis=(2, 3), keepdims=True)
    mx = out.max(axis=(2, 3), keepdims=True)

    def fc(v):
        h = jnp.maximum(conv(v, p["wfc1_pt"], 0), 0.0)
        return conv(h, p["wfc2_pt"], 0)

    ca = jax.nn.sigmoid(fc(avg) + fc(mx))
    out = ca * out

    avg_s = out.mean(axis=1, keepdims=True)
    max_s = out.max(axis=1, keepdims=True)
    sa = jax.nn.sigmoid(conv(jnp.concatenate([avg_s, max_s], axis=1), p["w7_pt"], 3))
    out = sa * out

    out = jnp.maximum(out + x_nchw, 0.0)
    return out.mean(axis=(2, 3))


if __name__ == "__main__":
    b_fold, build_dtype = _tpu_config()

    key = jax.random.PRNGKey(0)
    pkey, xkey = jax.random.split(key)
    params = make_params(pkey, b_fold, build_dtype)

    x_nchw = jax.random.normal(xkey, (N, C, H, W), jnp.float32)

    out = varm_pallas(x_nchw, params, b_fold, build_dtype)
    out = jax.block_until_ready(out)
    assert out.shape == (N, C)

    ref = varm_ref(x_nchw, params)
    max_err = float(jnp.max(jnp.abs(out - ref)))
    # bf16 matmul operands (im2col / SA activations) dominate the error budget.
    if not jnp.allclose(out, ref, atol=5e-3, rtol=5e-3):
        raise AssertionError(f"Pallas/reference mismatch, max abs err = {max_err}")
    print("KERNEL_OK")
</pallas_src>

<mosaic_0001>
module attributes {stable_mosaic.version = 11 : i64} {
  func.func @probe(%arg0: memref<8x128xi32, #tpu.memory_space<vmem>>, %arg1: memref<8x128xi32, #tpu.memory_space<vmem>>) attributes {dimension_semantics = [], scalar_prefetch = 0 : i64, scratch_operands = 0 : i64, tpu.core_type = #tpu.core_type<tc>} {
    %c0 = arith.constant 0 : index
    %c0_0 = arith.constant 0 : index
    %0 = vector.load %arg0[%c0, %c0_0] : memref<8x128xi32, #tpu.memory_space<vmem>>, vector<8x128xi32>
    %c1_i32 = arith.constant 1 : i32
    %1 = tpu.dynamic_rotate %0 by %c1_i32 dim 1 : vector<8x128xi32>, i32 -> vector<8x128xi32>
    %c0_1 = arith.constant 0 : index
    %c0_2 = arith.constant 0 : index
    %2 = vector.load %arg1[%c0_1, %c0_2] : memref<8x128xi32, #tpu.memory_space<vmem>>, vector<8x128xi32>
    tpu.vector_store %arg1[%c0_1, %c0_2], %1 {strides = array<i32>} : memref<8x128xi32, #tpu.memory_space<vmem>>, vector<8x128xi32>,
    return
  }
}

</mosaic_0001>

<bundles_post_ra>
// kernel: tpu_custom_call.1
= control target key start
LH: loop header
LB: loop body
LE: loop exit
PB: predicated region body
PF: predicated region fallthrough
CT: control target
= control target key end

     0   :  { %6 = vsyncpa [#allocation3], 0  ;;  %s128_s0 = inlined_call_operand.hbm [shape: s32[8,128], index: 0, kind: input, shape index: {}]   ;;  %s129_s1 = inlined_call_operand.hbm [shape: s32[8,128], index: 1, kind: output, shape index: {}]  }
   0x1   :  { %7 = vsyncpa [#allocation4], 0  ;;  %s91_s6 = smov [#allocation2]   ;;  %s43_s10 = scalar_lea.hbm %s128_s0, 128 }
   0x2   :  { %s14_s7 = sshll.u32 %s91_s6, 4  ;;  %p44_p0 = scmp.ne.s32.totalorder %s128_s0, %s43_s10  ;;  %s15_s7 = int_to_ptr.vmem [resolvable:$true] %s14_s7 }
   0x3   :  { %p47_p1 = scmp.lt.u32.totalorder %s43_s10, %s128_s0 }
   0x5   :  { %p49_p2 = pnand %p47_p1, %p44_p0 }
   0x7   :  { %52 = shalt.err (!%p49_p2)
}
   0x8   :  { %s53_s15 = scalar_lea.vmem %s15_s7, 128  ;;  %p58_p4 = scmp.lt.s32.totalorder %s15_s7, %s15_s7 }
   0x9   :  { %p54_p3 = scmp.ne.s32.totalorder %s15_s7, %s53_s15  ;;  %p59_p5 = scmp.lt.s32.totalorder %s53_s15, %s53_s15 }
   0xb   :  { %p60_p6 = por %p59_p5, %p58_p4 }
   0xd   :  { %p61_p7 = pnand %p60_p6, %p54_p3 }
   0xf   :  { %64 = shalt.err (!%p61_p7)
}
  0x10   :  { %17 = dma.hbm_to_vmem [thread:$0]  %s128_s0, 128, %s15_s7, [#allocation3]  }
  0x11   :  { %87 = dma.done.wait [#allocation3], 128  }
  0x12   :  { %88 = vsyncadd [#allocation3], 4294967168  ;;  %v21_v0 = vld [vmem:[#allocation2] sm:$0xff]  ;;  %s92_s18 = smov 1   ;;  %s93_s19 = smov [#allocation5]  }
  0x13   :  { %22 = vrot.lane.b32.xlu0 %v21_v0, %s92_s18  ;;  %s31_s20 = sshll.u32 %s93_s19, 4  ;;  %s32_s20 = int_to_ptr.vmem [resolvable:$true] %s31_s20 }
  0x14   :  { %s65_s21 = scalar_lea.vmem %s32_s20, 128  ;;  %p70_p9 = scmp.lt.s32.totalorder %s32_s20, %s32_s20 }
  0x15   :  { %p66_p8 = scmp.ne.s32.totalorder %s32_s20, %s65_s21  ;;  %p71_p10 = scmp.lt.s32.totalorder %s65_s21, %s65_s21 }
  0x17   :  { %p72_p11 = por %p71_p10, %p70_p9 }
  0x19   :  { %p73_p12 = pnand %p72_p11, %p66_p8 }
  0x85   :  { %v23_v1 = vpop.permute.xlu0 %22 }
  0x86   :  { %24 = vst [vmem:[#allocation5] sm:$0xff] %v23_v1 }
  0x87   :  { %76 = shalt.err (!%p73_p12)
}
  0x88   :  { %s77_s0 = scalar_lea.hbm %s129_s1, 128 }
  0x89   :  { %p78_p13 = scmp.ne.s32.totalorder %s129_s1, %s77_s0  ;;  %p81_p0 = scmp.lt.u32.totalorder %s77_s0, %s129_s1 }
  0x8b   :  { %p83_p1 = pnand %p81_p0, %p78_p13 }
  0x8d   :  { %86 = shalt.err (!%p83_p1)
}
  0x8e   :  { %34 = dma.vmem_to_hbm [thread:$0]  %s32_s20, 128, %s129_s1, [#allocation4]  }
  0x8f   :  { %89 = dma.done.wait [#allocation4], 128  }
  0x90   :  { %90 = vsyncadd [#allocation4], 4294967168 }
  0x91   :  { %38 = vsyncpa [#allocation3], 1 }
  0x92   :  { %39 = vsyncpa [#allocation4], 1 }

</bundles_post_ra>
